<compile_context>
chip_gen: v7x
topology: tpu7x:2x2x1
jax: 0.10.0
libtpu: 0.0.40
codegen_flags: <defaults>
</compile_context>

<pallas_src>
import jax
import jax.numpy as jnp
from jax.experimental import pallas as pl
from jax.experimental.pallas import tpu as pltpu


def _make_kernel(weight_layout):
    # "hi": weight tile is (tp, th, tk)  (PyTorch (P,H,I) layout, contract on last dims)
    # "ih": weight tile is (tp, tk, th)  (pre-transposed offline, MXU-native (K,N))
    eq = "pbk,phk->pbh" if weight_layout == "hi" else "pbk,pkh->pbh"

    def kernel(off_ref, x_ref, w_ref, b_ref, o_ref, acc_ref):
        # off_ref (scalar prefetch, SMEM) is consumed only by the index_maps.
        del off_ref
        k = pl.program_id(2)

        @pl.when(k == 0)
        def _():
            acc_ref[...] = jnp.zeros_like(acc_ref)

        # acc[p, b, h] += sum_k x[p, b, k] * w[p, h, k]
        acc_ref[...] += jnp.einsum(
            eq, x_ref[...], w_ref[...], preferred_element_type=jnp.float32
        )

        @pl.when(k == pl.num_programs(2) - 1)
        def _():
            res = acc_ref[...] + b_ref[...].astype(jnp.float32)  # (tp,1,th) bcast
            o_ref[...] = res.astype(o_ref.dtype)

    return kernel


def _vmem_budget():
    """(tile budget, scoped vmem limit) derived from the chip's VMEM capacity."""
    try:
        info = pltpu.get_tpu_info()
        cap = int(getattr(info, "vmem_capacity_bytes", 0)) or (64 << 20)
    except Exception:
        cap = 64 << 20  # conservative fallback: v7x-class 64 MiB per TensorCore
    if cap <= (80 << 20):          # v7x-class part
        return 26 << 20, 40 << 20
    return 80 << 20, 104 << 20     # v5e / v6e (128 MiB physical VMEM)


def _candidates(n, cands):
    out = [c for c in cands if c <= n and n % c == 0]
    return out if out else [n]


def _select_tiles(B, S, H, I, itemsizes, budget):
    x_it, w_it, b_it, o_it = itemsizes
    Bp = max(B, 8)  # (tp, B, *) VMEM blocks are sublane-padded to 8 rows

    def tile_bytes(tp, th, tk):
        db = 2  # double-buffered BlockSpec pipeline
        return (
            tp * th * tk * w_it * db      # weight tile (dominant stream)
            + tp * Bp * tk * x_it * db    # x tile
            + tp * 8 * th * b_it * db     # bias tile ((tp,1,th) pads to 8 rows)
            + tp * Bp * th * o_it * db    # output tile
            + tp * Bp * th * 4            # f32 accumulator scratch
            + (2 << 20)                   # margin for compiler internal scratch
        )

    th_cands = _candidates(H, (1024, 512, 256, 128))
    tk_cands = _candidates(I, (1024, 512, 256, 128))
    tp_cands = sorted(
        {d for d in (S, 512, 256, 128, 64, 32, 16, 8, 4, 2, 1)
         if d <= S and S % d == 0},
        reverse=True,
    )

    best, best_key = None, None
    fallback, fallback_bytes = None, None
    for tp in tp_cands:
        for th in th_cands:
            for tk in tk_cands:
                nbytes = tile_bytes(tp, th, tk)
                if fallback is None or nbytes < fallback_bytes:
                    fallback, fallback_bytes = (tp, th, tk), nbytes
                if nbytes <= budget:
                    key = (tp * th * tk, th, tk)  # maximize weight-tile DMA size
                    if best_key is None or key > best_key:
                        best, best_key = (tp, th, tk), key
    tp, th, tk = best if best is not None else fallback

    # Keep >= 2 blocks on a parallel grid axis so both v7x TensorCores get work.
    if (S // tp) * (H // th) < 2:
        if th % 256 == 0:
            th //= 2
        elif tp > 1:
            tp = max(d for d in tp_cands if d < tp)

    return tp, th, tk, tile_bytes(tp, th, tk)


def independent_projection(x, weight, bias, input_pos=None, *, weight_layout="hi"):
    """Forward of Independent_Projection.

    x:      (B, S, I)
    weight: (P, H, I) if weight_layout == "hi"  (PyTorch parameter layout)
            (P, I, H) if weight_layout == "ih"  (pre-transposed once, offline)
    bias:   (P, H)
    Returns (B, S, H) = einsum('bsi,shi->bsh', x, W[s0:s0+S]) + bias[s0:s0+S],
    where s0 = 0 if input_pos is None else input_pos * S.
    """
    assert weight_layout in ("hi", "ih")
    B, S, I = x.shape
    if weight_layout == "hi":
        P, H, Iw = weight.shape
    else:
        P, Iw, H = weight.shape
    assert Iw == I, (Iw, I)
    assert bias.shape == (P, H), (bias.shape, (P, H))
    if input_pos is None:
        assert S <= P, (S, P)
    elif isinstance(input_pos, int):
        # PyTorch indexing would not silently wrap an out-of-range window; be strict.
        assert 0 <= input_pos and (input_pos + 1) * S <= P, (input_pos, S, P)
    # else: traced input_pos — caller is responsible for the bound.

    out_dtype = jnp.result_type(x.dtype, weight.dtype, bias.dtype)
    # Keep the (huge) weight stream in its stored dtype (bf16 supported); cast
    # only the tiny x so the in-kernel matmul has matching operand dtypes.
    if x.dtype != weight.dtype:
        x = x.astype(weight.dtype)

    budget, vmem_limit = _vmem_budget()
    itemsizes = (
        x.dtype.itemsize,
        weight.dtype.itemsize,
        bias.dtype.itemsize,
        jnp.dtype(out_dtype).itemsize,
    )
    tp, th, tk, tile_b = _select_tiles(B, S, H, I, itemsizes, budget)
    if tile_b > budget:  # pathological shapes: raise scoped limit instead of failing
        vmem_limit = max(vmem_limit, tile_b + (4 << 20))

    # Positions-major x / out (leading batch dim for the per-position matmul).
    # x and out are tiny relative to the weight stream, so these transposes and
    # the bias reshape below cost negligible HBM traffic.
    x_t = jnp.transpose(x, (1, 0, 2))   # (S, B, I)
    bias3 = bias.reshape(P, 1, H)       # (P, 1, H): keeps the bias block 3-D so the
                                        # (sublane, lane) dims are (1, th) for any tp

    # Block offset along positions, prefetched to SMEM and used only inside the
    # index_maps — the kernel streams directly from the full weight in HBM.
    pos = 0 if input_pos is None else input_pos
    off_arr = (jnp.asarray(pos, dtype=jnp.int32) * (S // tp)).reshape(1)

    if weight_layout == "hi":
        w_spec = pl.BlockSpec((tp, th, tk), lambda p, h, k, off: (off[0] + p, h, k))
    else:
        w_spec = pl.BlockSpec((tp, tk, th), lambda p, h, k, off: (off[0] + p, k, h))

    grid = (S // tp, H // th, I // tk)

    out_t = pl.pallas_call(
        _make_kernel(weight_layout),
        out_shape=jax.ShapeDtypeStruct((S, B, H), out_dtype),
        grid_spec=pltpu.PrefetchScalarGridSpec(
            num_scalar_prefetch=1,
            grid=grid,
            in_specs=[
                pl.BlockSpec((tp, B, tk), lambda p, h, k, off: (p, 0, k)),
                w_spec,
                pl.BlockSpec((tp, 1, th), lambda p, h, k, off: (off[0] + p, 0, h)),
            ],
            out_specs=pl.BlockSpec((tp, B, th), lambda p, h, k, off: (p, 0, h)),
            scratch_shapes=[pltpu.VMEM((tp, B, th), jnp.float32)],
        ),
        compiler_params=pltpu.CompilerParams(
            dimension_semantics=("parallel", "parallel", "arbitrary"),
            vmem_limit_bytes=int(vmem_limit),
        ),
    )(off_arr, x_t, weight, bias3)

    return jnp.transpose(out_t, (1, 0, 2))  # (B, S, H)


if __name__ == "__main__":
    key = jax.random.PRNGKey(0)
    k1, k2, k3 = jax.random.split(key, 3)

    batch, num_positions, seq_len = 2, 16, 8
    input_dim, hidden_dim = 128, 128

    x = jax.random.normal(k1, (batch, seq_len, input_dim), dtype=jnp.float32)
    weight = jax.random.normal(
        k2, (num_positions, hidden_dim, input_dim), dtype=jnp.float32
    )
    bias = jax.random.normal(k3, (num_positions, hidden_dim), dtype=jnp.float32)

    def reference(x, w_full, b_full, input_pos=None):
        S = x.shape[1]
        start = 0 if input_pos is None else input_pos * S
        w = jax.lax.dynamic_slice_in_dim(w_full, start, S, axis=0)
        b = jax.lax.dynamic_slice_in_dim(b_full, start, S, axis=0)
        return (
            jnp.einsum("bsi,shi->bsh", x, w, precision=jax.lax.Precision.HIGHEST) + b
        )

    # 1) Default path (weight[:seq_len]).
    out = independent_projection(x, weight, bias)
    jax.block_until_ready(out)
    assert out.shape == (batch, seq_len, hidden_dim)
    ref = reference(x, weight, bias)
    assert jnp.allclose(out, ref, atol=1e-3, rtol=1e-3), "mismatch (input_pos=None)"

    # 2) input_pos path (offset folded into the index_map, no HBM weight copy).
    out1 = independent_projection(x, weight, bias, input_pos=1)
    jax.block_until_ready(out1)
    ref1 = reference(x, weight, bias, input_pos=1)
    assert jnp.allclose(out1, ref1, atol=1e-3, rtol=1e-3), "mismatch (input_pos=1)"

    # 3) Pre-transposed (P, I, H) weight layout (one-time offline re-layout,
    #    MXU-native (K, N) orientation for the streamed weight tile).
    weight_ih = jnp.transpose(weight, (0, 2, 1))
    out2 = independent_projection(x, weight_ih, bias, input_pos=1, weight_layout="ih")
    jax.block_until_ready(out2)
    assert jnp.allclose(out2, ref1, atol=1e-3, rtol=1e-3), "mismatch (ih layout)"

    # 4) bf16 weight streaming with f32 accumulation in the kernel.
    x_bf = x.astype(jnp.bfloat16)
    w_bf = weight.astype(jnp.bfloat16)
    out_bf = independent_projection(x_bf, w_bf, bias)
    jax.block_until_ready(out_bf)
    ref_bf = (
        jnp.einsum(
            "bsi,shi->bsh",
            x_bf.astype(jnp.float32),
            w_bf[:seq_len].astype(jnp.float32),
            precision=jax.lax.Precision.HIGHEST,
        )
        + bias[:seq_len]
    )
    assert jnp.allclose(out_bf, ref_bf, atol=1e-2, rtol=1e-2), "mismatch (bf16)"

    print("KERNEL_OK")
</pallas_src>

<mosaic_0001>
module attributes {stable_mosaic.version = 11 : i64} {
  func.func @kernel(%arg0: i32, %arg1: i32, %arg2: i32, %arg3: memref<1xi32, #tpu.memory_space<smem>>, %arg4: memref<4x2x128xf32, #tpu.memory_space<vmem>>, %arg5: memref<4x128x128xf32, #tpu.memory_space<vmem>>, %arg6: memref<4x1x128xf32, #tpu.memory_space<vmem>>, %arg7: memref<4x2x128xf32, #tpu.memory_space<vmem>>, %arg8: memref<4x2x128xf32, #tpu.memory_space<vmem>>) attributes {dimension_semantics = [#tpu.dimension_semantics<parallel>, #tpu.dimension_semantics<parallel>, #tpu.dimension_semantics<arbitrary>], iteration_bounds = array<i64: 2, 1, 1>, scalar_prefetch = 1 : i64, scratch_operands = 1 : i64, tpu.core_type = #tpu.core_type<tc>, window_params = [{transform_indices = @transform_0, window_bounds = array<i64: 4, 2, 128>}, {transform_indices = @transform_1, window_bounds = array<i64: 4, 128, 128>}, {transform_indices = @transform_2, window_bounds = array<i64: 4, 1, 128>}, {transform_indices = @transform_3, window_bounds = array<i64: 4, 2, 128>}]} {
    %c0_i32 = arith.constant 0 : i32
    %0 = arith.cmpi eq, %arg2, %c0_i32 : i32
    %1 = arith.extui %0 : i1 to i32
    %c0_i32_0 = arith.constant 0 : i32
    %2 = arith.cmpi ne, %1, %c0_i32_0 : i32
    scf.if %2 {
      %cst_14 = arith.constant 0.000000e+00 : f32
      %12 = vector.broadcast %cst_14 : f32 to vector<4x2x128xf32>
      %c0_15 = arith.constant 0 : index
      %c0_16 = arith.constant 0 : index
      %c0_17 = arith.constant 0 : index
      %13 = vector.load %arg8[%c0_15, %c0_16, %c0_17] : memref<4x2x128xf32, #tpu.memory_space<vmem>>, vector<4x2x128xf32>
      tpu.vector_store %arg8[%c0_15, %c0_16, %c0_17], %12 {strides = array<i32>} : memref<4x2x128xf32, #tpu.memory_space<vmem>>, vector<4x2x128xf32>,
    } else {
    }
    %c0 = arith.constant 0 : index
    %c0_1 = arith.constant 0 : index
    %c0_2 = arith.constant 0 : index
    %3 = vector.load %arg8[%c0, %c0_1, %c0_2] : memref<4x2x128xf32, #tpu.memory_space<vmem>>, vector<4x2x128xf32>
    %c0_3 = arith.constant 0 : index
    %c0_4 = arith.constant 0 : index
    %c0_5 = arith.constant 0 : index
    %4 = vector.load %arg4[%c0_3, %c0_4, %c0_5] : memref<4x2x128xf32, #tpu.memory_space<vmem>>, vector<4x2x128xf32>
    %c0_6 = arith.constant 0 : index
    %c0_7 = arith.constant 0 : index
    %c0_8 = arith.constant 0 : index
    %5 = vector.load %arg5[%c0_6, %c0_7, %c0_8] : memref<4x128x128xf32, #tpu.memory_space<vmem>>, vector<4x128x128xf32>
    "tpu.trace_start"() <{level = 10 : i32, message = "pbk,phk->pbh"}> : () -> ()
    %cst = arith.constant dense<0.000000e+00> : vector<4x2x128xf32>
    %6 = tpu.matmul %4, %5, %cst {dimension_numbers = #tpu.dot_dimension_numbers<[2], [2], [1], [1], [0, 0, 0, 1, 1, 1], [0], [0]>} : vector<4x2x128xf32>, vector<4x128x128xf32>, vector<4x2x128xf32> -> vector<4x2x128xf32>
    "tpu.trace_stop"() : () -> ()
    %7 = arith.addf %3, %6 : vector<4x2x128xf32>
    %c0_9 = arith.constant 0 : index
    %c0_10 = arith.constant 0 : index
    %c0_11 = arith.constant 0 : index
    %8 = vector.load %arg8[%c0_9, %c0_10, %c0_11] : memref<4x2x128xf32, #tpu.memory_space<vmem>>, vector<4x2x128xf32>
    tpu.vector_store %arg8[%c0_9, %c0_10, %c0_11], %7 {strides = array<i32>} : memref<4x2x128xf32, #tpu.memory_space<vmem>>, vector<4x2x128xf32>,
    %c0_i32_12 = arith.constant 0 : i32
    %9 = arith.cmpi eq, %arg2, %c0_i32_12 : i32
    %10 = arith.extui %9 : i1 to i32
    %c0_i32_13 = arith.constant 0 : i32
    %11 = arith.cmpi ne, %10, %c0_i32_13 : i32
    scf.if %11 {
      %c0_14 = arith.constant 0 : index
      %c0_15 = arith.constant 0 : index
      %c0_16 = arith.constant 0 : index
      %12 = vector.load %arg8[%c0_14, %c0_15, %c0_16] : memref<4x2x128xf32, #tpu.memory_space<vmem>>, vector<4x2x128xf32>
      %c0_17 = arith.constant 0 : index
      %c0_18 = arith.constant 0 : index
      %c0_19 = arith.constant 0 : index
      %13 = vector.load %arg6[%c0_17, %c0_18, %c0_19] : memref<4x1x128xf32, #tpu.memory_space<vmem>>, vector<4x1x128xf32>
      %14 = vector.broadcast %13 : vector<4x1x128xf32> to vector<4x2x128xf32>
      %15 = arith.addf %12, %14 : vector<4x2x128xf32>
      %c0_20 = arith.constant 0 : index
      %c0_21 = arith.constant 0 : index
      %c0_22 = arith.constant 0 : index
      %16 = vector.load %arg7[%c0_20, %c0_21, %c0_22] : memref<4x2x128xf32, #tpu.memory_space<vmem>>, vector<4x2x128xf32>
      tpu.vector_store %arg7[%c0_20, %c0_21, %c0_22], %15 {strides = array<i32>} : memref<4x2x128xf32, #tpu.memory_space<vmem>>, vector<4x2x128xf32>,
    } else {
    }
    return
  }
  func.func @transform_0(%arg0: i32, %arg1: i32, %arg2: i32, %arg3: memref<1xi32, #tpu.memory_space<smem>>) -> (i32, i32, i32) {
    %c0_i32 = arith.constant 0 : i32
    %c0_i32_0 = arith.constant 0 : i32
    return %arg0, %c0_i32, %arg2 : i32, i32, i32
  }
  func.func @transform_1(%arg0: i32, %arg1: i32, %arg2: i32, %arg3: memref<1xi32, #tpu.memory_space<smem>>) -> (i32, i32, i32) {
    %c0 = arith.constant 0 : index
    %0 = memref.load %arg3[%c0] : memref<1xi32, #tpu.memory_space<smem>>
    %1 = arith.addi %0, %arg0 : i32
    %c0_i32 = arith.constant 0 : i32
    return %1, %arg1, %arg2 : i32, i32, i32
  }
  func.func @transform_2(%arg0: i32, %arg1: i32, %arg2: i32, %arg3: memref<1xi32, #tpu.memory_space<smem>>) -> (i32, i32, i32) {
    %c0 = arith.constant 0 : index
    %0 = memref.load %arg3[%c0] : memref<1xi32, #tpu.memory_space<smem>>
    %1 = arith.addi %0, %arg0 : i32
    %c0_i32 = arith.constant 0 : i32
    %c0_i32_0 = arith.constant 0 : i32
    return %1, %c0_i32, %arg1 : i32, i32, i32
  }
  func.func @transform_3(%arg0: i32, %arg1: i32, %arg2: i32, %arg3: memref<1xi32, #tpu.memory_space<smem>>) -> (i32, i32, i32) {
    %c0_i32 = arith.constant 0 : i32
    %c0_i32_0 = arith.constant 0 : i32
    return %arg0, %c0_i32, %arg1 : i32, i32, i32
  }
}

</mosaic_0001>

<bundles_post_ra>
// kernel: tpu_custom_call.1
= control target key start
LH: loop header
LB: loop body
LE: loop exit
PB: predicated region body
PF: predicated region fallthrough
CT: control target
= control target key end

     0   :  { %s2130_s0 = inlined_call_operand.<no memory space> [shape: s32[1], index: 0, kind: input, shape index: {}]   ;;  %s2131_s1 = inlined_call_operand.hbm [shape: f32[8,2,128], index: 1, kind: input, shape index: {}]   ;;  %s2132_s2 = inlined_call_operand.hbm [shape: f32[16,128,128], index: 2, kind: input, shape index: {}]   ;;  %s2133_s3 = inlined_call_operand.hbm [shape: f32[16,1,128], index: 3, kind: input, shape index: {}]   ;;  %s2134_s4 = inlined_call_operand.hbm [shape: f32[8,2,128], index: 4, kind: output, shape index: {}]  }
   0x1   :  { %2148 = sst [smem:[#allocation23_spill]] %s2131_s1 }
   0x2   :  { %2149 = sst [smem:[#allocation24_spill]] %s2132_s2 }
   0x3   :  { %2150 = sst [smem:[#allocation25_spill]] %s2134_s4 }
   0x4   :  { %9 = sst [smem:[#allocation4]] %s2130_s0 }
   0x5   :  { %10 = vsyncpa [#allocation6], 0 }
   0x6   :  { %12 = vsyncpa [#allocation6 + $0x1], 0 }
   0x7   :  { %13 = vsyncpa [#allocation9], 0 }
   0x8   :  { %15 = vsyncpa [#allocation9 + $0x1], 0 }
   0x9   :  { %16 = vsyncpa [#allocation7], 0 }
   0xa   :  { %18 = vsyncpa [#allocation7 + $0x1], 0  ;;  %s1630_s17 = smov 0   ;;  %s1632_s18 = smov 0  }
   0xb   :  { %s1634_s19 = smov 0   ;;  %s1636_s20 = smov 0  }
   0xc   :  { %s1638_s21 = smov 0   ;;  %s1640_s22 = smov 0  }
   0xd   :  { %s1642_s23 = smov 0   ;;  %s1644_s0 = smov 0  }
   0xe   :  { %s1646_s24 = smov 0   ;;  %s1648_s25 = smov 0  }
   0xf   :  { %s1650_s26 = smov 0   ;;  %s1652_s27 = smov 0  }
  0x10 LB: > { %2151 = sst [smem:[#allocation16_spill]] %s1561_s22  ;;  %s1689_s28 = sadd.s32 4294967295, %s1585_s27   ;;  %s1585_s27 = sphi %s1652_s27, %s24_s27   ;;  %s1581_s26 = sphi %s1650_s26, %s2191_s26   ;;  %s1577_s25 = sphi %s1648_s25, %s2199_s25   ;;  %s1573_s24 = sphi %s1646_s24, %s2189_s24   ;;  %s1569_s0 = sphi %s1644_s0, %s2198_s0   ;;  %s1565_s23 = sphi %s1642_s23, %s2197_s23   ;;  %s1561_s22 = sphi %s1640_s22, %s2187_s22   ;;  %s1557_s21 = sphi %s1638_s21, %s2196_s21   ;;  %s1553_s20 = sphi %s1636_s20, %s2195_s20   ;;  %s1549_s19 = sphi %s1634_s19, %s2194_s19   ;;  %s1545_s18 = sphi %s1632_s18, %s2193_s18   ;;  %s1541_s17 = sphi %s1630_s17, %s2192_s17  }
  0x11   : > { %2152 = sst [smem:[#allocation17_spill]] %s1573_s24  ;;  %s43_s29 = sadd.s32 1, %s1581_s26 }
  0x12   : > { %2153 = sst [smem:[#allocation18_spill]] %s1577_s25  ;;  %p45_p0 = scmp.ge.s32.totalorder %s43_s29, 2 }
  0x13   : > { %2154 = sst [smem:[#allocation19_spill]] %s1581_s26  ;;  %p2139_p1 = scmp.eq.s32.totalorder %s1585_s27, 0 }
  0x14   : > { %p2138_p2 = scmp.eq.s32.totalorder %s1689_s28, 0  ;;  %s75_s30 = sld [smem:[#allocation4]] }
  0x15   : > { %s2201_s29 = smov (%p45_p0, %s43_s29), 0  ;;  %s86_s5 = sadd.s32 1, %s1561_s22 }
  0x16   : > { %2155 = sst [smem:[#allocation20_spill]] %s2201_s29  ;;  %p93_p3 = scmp.ne.s32.totalorder %s1561_s22, %s1557_s21 }
  0x17   : > { %p99_p4 = scmp.ne.s32.totalorder %s1557_s21, %s1553_s20  ;;  %p2137_p7 = scmp.lt.s32.totalorder %s1585_s27, 2 }
  0x18   : > { %p1703_p6 = por %p93_p3, %p2139_p1  ;;  %s205_s8 = sand.u32 1, %s1585_s27  }
  0x19   : > { %p1710_p8 = por %p99_p4, %p2138_p2  ;;  %s207_s12 = sand.u32 1, %s1561_s22  }
  0x1a   : > { %s1716_s9 = sadd.s32 %s1581_s26, %s75_s30  ;;  %s78_s10 = sadd.s32 %s75_s30, %s2201_s29 }
  0x1b   : > { %s2157_s7 = scalar_select %p1710_p8, 1, 0 }
  0x1c   : > { %s1720_s11 = ssub.s32 %s1716_s9, %s78_s10  ;;  %s896_s13 = sshll.u32 %s207_s12, 9 }
  0x1d   : > { %p2136_p9 = scmp.eq.s32.totalorder %s1720_s11, 0  ;;  %s919_s14 = sshll.u32 %s1716_s9, 13 }
  0x1e   : > { %s2159_s2 = sld [smem:[#allocation24_spill]]  ;;  %s209_s30 = scalar_lea.vmem [#allocation8], %s896_s13 }
  0x1f   : > { %s1728_s15 = scalar_select %p2136_p9, %s1561_s22, %s86_s5  }
  0x20   : > { %s222_s10 = sshll.u32 %s209_s30, 4  ;;  %p1739_p10 = pnand %p2137_p7, %p1703_p6  ;;  %s1743_s10 = int_to_ptr.vmem [resolvable:$true] %s222_s10 }
  0x21   : > { %2158 = sst [smem:[#allocation21_spill]] %s1728_s15  ;;  %s1745_s5 = scalar_lea.sflag [#allocation9], %s205_s8 }
  0x22   : > { %p1359_p12 = pneg %p1739_p10 }
  0x24   : > { %s1733_s4 = scalar_lea.hbm %s2159_s2, %s919_s14  ;;  %s1362_s14 = scalar_lea.hbm %s2159_s2, 32768 }
  0x25   : > { %s1357_s12 = scalar_lea.hbm %s1733_s4, 8192  ;;  %p1363_p3 = scmp.lt.u32.totalorder %s1733_s4, %s2159_s2 }
  0x26   : > { %p1358_p11 = scmp.ne.s32.totalorder %s1733_s4, %s1357_s12  ;;  %p1364_p4 = scmp.lt.u32.totalorder %s1362_s14, %s1357_s12 }
  0x27   : > { %p1366_p5 = scmp.lt.u32.totalorder %s1357_s12, %s1733_s4 }
  0x28   : > { %p1360_p13 = pnand %p1359_p12, %p1358_p11  ;;  %p1365_p6 = por %p1364_p4, %p1363_p3 }
  0x2a   : > { %p1361_p0 = pneg %p1360_p13  ;;  %p1367_p9 = por %p1366_p5, %p1365_p6 }
  0x2c   : > { %p1368_p7 = pnand %p1367_p9, %p1361_p0 }
  0x2e   : > { %1371 = shalt.err (!%p1368_p7)
}
  0x2f   : > { %s1372_s8 = scalar_lea.vmem %s1743_s10, 8192  ;;  %s1587_s30 = smov [#allocation8]  }
  0x30   : > { %p1373_p11 = scmp.ne.s32.totalorder %s1743_s10, %s1372_s8  ;;  %s1377_s6 = sshll.u32 %s1587_s30, 4  ;;  %s1378_s6 = int_to_ptr.vmem [resolvable:$false] %s1377_s6 }
  0x31   : > { %s1379_s13 = scalar_lea.vmem %s1378_s6, 16384  ;;  %p1380_p1 = scmp.lt.s32.totalorder %s1743_s10, %s1378_s6 }
  0x32   : > { %p1375_p13 = pnand %p1373_p11, %p1359_p12  ;;  %p1381_p3 = scmp.lt.s32.totalorder %s1379_s13, %s1372_s8 }
  0x34   : > { %p1376_p2 = pneg %p1375_p13  ;;  %p1382_p4 = por %p1381_p3, %p1380_p1 }
  0x36   : > { %p1383_p5 = pnand %p1382_p4, %p1376_p2 }
  0x38   : > { %1386 = shalt.err (!%p1383_p5)
}
  0x39   : > { %s1588_s12 = smov 128   ;;  %s1589_s14 = smov 8  }
  0x3a   : > { %1240 = dma.hbm_to_vmem [thread:$0]  (!%p1739_p10), %s1733_s4, 8192, %s1743_s10, %s1745_s5, %s1588_s12, %s1588_s12, %s1589_s14  }
  0x3b   : > { %p903_p1 = scmp.ge.s32.totalorder %s1585_s27, 1  ;;  %p254_p2 = scmp.lt.s32.totalorder %s1585_s27, 3 }
  0x3c   : > { %s890_s20 = sadd.s32 4294967294, %s1585_s27   ;;  %s47_s8 = ssub.s32 %s1581_s26, %s2201_s29 }
  0x3d   : > { %p1775_p7 = pnand %p903_p1, %p254_p2  ;;  %s52_s30 = sadd.s32 1, %s1573_s24 }
  0x3e   : > { %p50_p9 = scmp.eq.s32.totalorder %s47_s8, 0  ;;  %p59_p12 = scmp.ne.s32.totalorder %s1573_s24, %s1569_s0 }
  0x3f   : > { %p65_p0 = scmp.ne.s32.totalorder %s1569_s0, %s1565_s23  ;;  %p157_p6 = scmp.eq.s32.totalorder %s1689_s28, 1 }
  0x40   : > { %s1789_s6 = scalar_select %p50_p9, %s1573_s24, %s52_s30  }
  0x41   : > { %p2163_p11 = scmp.eq.s32.totalorder %s1585_s27, 0  ;;  %p2164_p13 = scmp.eq.s32.totalorder %s1689_s28, 0 }
  0x42   : > { %2162 = sst [smem:[#allocation22_spill]] %s1789_s6  ;;  %p1799_p4 = por %p157_p6, %p59_p12 }
  0x43   : > { %p61_p10 = por %p2163_p11, %p59_p12  ;;  %p1795_p3 = por %p2164_p13, %p65_p0 }
  0x44   : > { %s2166_s25 = scalar_select %p1799_p4, 1, 0 }
  0x45   : > { %s2165_s4 = scalar_select %p1795_p3, 1, 0 }
  0x46   : > { %p163_p5 = scmp.eq.s32.totalorder %s890_s20, 1  ;;  %s183_s10 = sand.u32 1, %s1573_s24  }
  0x47   : > { %s917_s13 = sshll.u32 %s1581_s26, 7  ;;  %s893_s14 = sshll.u32 %s183_s10, 3 }
  0x48   : > { %p1805_p1 = por %p163_p5, %p65_p0  ;;  %s2168_s1 = sld [smem:[#allocation23_spill]] }
  0x49   : > { %p2169_p2 = scmp.lt.s32.totalorder %s1585_s27, 2  ;;  %s187_s20 = scalar_lea.vmem [#allocation5], %s893_s14 }
  0x4a   : > { %s2167_s12 = scalar_select %p1805_p1, 1, 0 }
  0x4b   : > { %p1816_p9 = pnand %p2169_p2, %p61_p10  ;;  %s195_s26 = sshll.u32 %s187_s20, 4  ;;  %s1820_s26 = int_to_ptr.vmem [resolvable:$true] %s195_s26 }
  0x4c   : > { %s1822_s6 = scalar_lea.sflag [#allocation6], %s183_s10 }
  0x4d   : > { %p1389_p0 = pneg %p1816_p9 }
  0x4e   : > { %s1812_s2 = scalar_lea.hbm %s2168_s1, %s917_s13  ;;  %s1392_s24 = scalar_lea.hbm %s2168_s1, 256 }
  0x4f   : > { %s1387_s8 = scalar_lea.hbm %s1812_s2, 128  ;;  %p1393_p10 = scmp.lt.u32.totalorder %s1812_s2, %s2168_s1 }
  0x50   : > { %p1388_p12 = scmp.ne.s32.totalorder %s1812_s2, %s1387_s8  ;;  %p1394_p13 = scmp.lt.u32.totalorder %s1392_s24, %s1387_s8 }
  0x51   : > { %p1396_p2 = scmp.lt.u32.totalorder %s1387_s8, %s1812_s2 }
  0x52   : > { %p1390_p6 = pnand %p1389_p0, %p1388_p12  ;;  %p1395_p5 = por %p1394_p13, %p1393_p10 }
  0x54   : > { %p1391_p11 = pneg %p1390_p6  ;;  %p1397_p1 = por %p1396_p2, %p1395_p5 }
  0x56   : > { %p1398_p4 = pnand %p1397_p1, %p1391_p11 }
  0x58   : > { %1401 = shalt.err (!%p1398_p4)
}
  0x59   : > { %s1402_s10 = scalar_lea.vmem %s1820_s26, 128  ;;  %s1590_s14 = smov [#allocation5]  }
  0x5a   : > { %p1403_p12 = scmp.ne.s32.totalorder %s1820_s26, %s1402_s10  ;;  %s1407_s20 = sshll.u32 %s1590_s14, 4  ;;  %s1408_s20 = int_to_ptr.vmem [resolvable:$false] %s1407_s20 }
  0x5b   : > { %s1409_s22 = scalar_lea.vmem %s1408_s20, 256  ;;  %p1410_p3 = scmp.lt.s32.totalorder %s1820_s26, %s1408_s20 }
  0x5c   : > { %p1405_p6 = pnand %p1403_p12, %p1389_p0  ;;  %p1411_p10 = scmp.lt.s32.totalorder %s1409_s22, %s1402_s10 }
  0x5e   : > { %p1406_p8 = pneg %p1405_p6  ;;  %p1412_p13 = por %p1411_p10, %p1410_p3 }
  0x60   : > { %p1413_p5 = pnand %p1412_p13, %p1406_p8 }
  0x62   : > { %1416 = shalt.err (!%p1413_p5)
}
  0x63   : > { %s1591_s24 = smov 32   ;;  %s1592_s15 = smov 2  }
  0x64   : > { %1237 = dma.hbm_to_vmem [thread:$0]  (!%p1816_p9), %s1812_s2, 128, %s1820_s26, %s1822_s6, %s1591_s24, %s1591_s24, %s1592_s15  }
  0x65   : > { %s118_s8 = sadd.s32 1, %s1549_s19  ;;  %p2171_p8 = scmp.eq.s32.totalorder %s1720_s11, 0 }
  0x66   : > { %p125_p3 = scmp.ne.s32.totalorder %s1549_s19, %s1545_s18  ;;  %p131_p4 = scmp.ne.s32.totalorder %s1545_s18, %s1541_s17 }
  0x67   : > { %s1854_s13 = scalar_select %p2171_p8, %s1549_s19, %s118_s8  }
  0x68   : > { %s234_s30 = sand.u32 1, %s1549_s19   ;;  %s920_s10 = sshll.u32 %s1716_s9, 6 }
  0x69   : > { %p2172_p1 = scmp.eq.s32.totalorder %s1585_s27, 0  ;;  %p2173_p11 = scmp.eq.s32.totalorder %s1689_s28, 0 }
  0x6a   : > { %s900_s20 = sshll.u32 %s234_s30, 2  ;;  %s1873_s2 = scalar_lea.hbm %s2133_s3, %s920_s10 }
  0x6b   : > { %p127_p0 = por %p125_p3, %p2172_p1  ;;  %p1866_p2 = por %p131_p4, %p2173_p11 }
  0x6c   : > { %p2175_p9 = scmp.lt.s32.totalorder %s1585_s27, 2  ;;  %s236_s26 = scalar_lea.vmem [#allocation10], %s900_s20 }
  0x6d   : > { %s2174_s14 = scalar_select %p1866_p2, 1, 0 }
  0x6e   : > { %p1877_p12 = pnand %p2175_p9, %p127_p0  ;;  %s246_s29 = sshll.u32 %s236_s26, 4  ;;  %s1881_s29 = int_to_ptr.vmem [resolvable:$true] %s246_s29 }
  0x6f   : > { %s1417_s9 = scalar_lea.hbm %s1873_s2, 64  ;;  %s1422_s6 = scalar_lea.hbm %s2133_s3, 256 }
  0x70   : > { %p1418_p6 = scmp.ne.s32.totalorder %s1873_s2, %s1417_s9  ;;  %p1419_p10 = pneg %p1877_p12 }
  0x71   : > { %p1423_p8 = scmp.lt.u32.totalorder %s1873_s2, %s2133_s3  ;;  %p1424_p3 = scmp.lt.u32.totalorder %s1422_s6, %s1417_s9 }
  0x72   : > { %p1420_p13 = pnand %p1419_p10, %p1418_p6  ;;  %p1426_p1 = scmp.lt.u32.totalorder %s1417_s9, %s1873_s2 }
  0x73   : > { %p1425_p4 = por %p1424_p3, %p1423_p8 }
  0x74   : > { %p1421_p5 = pneg %p1420_p13 }
  0x75   : > { %p1427_p0 = por %p1426_p1, %p1425_p4 }
  0x77   : > { %p1428_p11 = pnand %p1427_p0, %p1421_p5 }
  0x79   : > { %1431 = shalt.err (!%p1428_p11)
}
  0x7a   : > { %s1432_s8 = scalar_lea.vmem %s1881_s29, 64  ;;  %s1593_s30 = smov [#allocation10]  }
  0x7b   : > { %p1433_p9 = scmp.ne.s32.totalorder %s1881_s29, %s1432_s8  ;;  %s1437_s10 = sshll.u32 %s1593_s30, 4  ;;  %s1438_s10 = int_to_ptr.vmem [resolvable:$false] %s1437_s10 }
  0x7c   : > { %s1439_s20 = scalar_lea.vmem %s1438_s10, 128  ;;  %p1440_p2 = scmp.lt.s32.totalorder %s1881_s29, %s1438_s10 }
  0x7d   : > { %p1435_p6 = pnand %p1433_p9, %p1419_p10  ;;  %p1441_p8 = scmp.lt.s32.totalorder %s1439_s20, %s1432_s8 }
  0x7f   : > { %p1436_p13 = pneg %p1435_p6  ;;  %p1442_p3 = por %p1441_p8, %p1440_p2 }
  0x81   : > { %p1443_p4 = pnand %p1442_p3, %p1436_p13 }
  0x83   : > { %1446 = shalt.err (!%p1443_p4)
}
  0x84   : > { %s1594_s22 = smov 16   ;;  %s1595_s26 = smov 1  }
  0x85   : > { %1243 = dma.hbm_to_vmem [thread:$0]  (!%p1877_p12), %s1873_s2, 64, %s1881_s29, %s1745_s5, %s1594_s22, %s1594_s22, %s1595_s26  }
  0x86   : > { %258 = sbr.rel (%p1775_p7) target bundleno = 521 (0x209), region = 32  ;;  %s1912_s9 = sand.u32 (!%p1775_p7), 1, %s1569_s0  }
  0x87   : > { %s904_s1 = sshll.u32 (!%p1775_p7), %s1912_s9, 3  ;;  %s261_s11 = scalar_lea.sflag (!%p1775_p7), [#allocation6], %s1912_s9 }
  0x88   : > { %s1918_s6 = scalar_lea.vmem (!%p1775_p7), [#allocation5], %s904_s1  ;;  %p2177_p2 = scmp.ne.s32.totalorder (!%p1775_p7), %s2165_s4, 0 }
  0x8d   : > { %1524 = dma.done.wait (%p2177_p2), %s261_s11, 128  }
  0x8e   : > { %1526 = vsyncadd (%p2177_p2), %s261_s11, 4294967168  ;;  %s269_s5 = sand.u32 1, %s1689_s28   ;;  %s271_s16 = sand.u32 1, %s1557_s21  }
  0x8f   : > { %s905_s2 = sshll.u32 %s271_s16, 9  ;;  %s270_s17 = scalar_lea.sflag [#allocation9], %s269_s5 }
  0x90   : > { %s1926_s29 = scalar_lea.vmem [#allocation8], %s905_s2  ;;  %p2178_p7 = scmp.ne.s32.totalorder %s2157_s7, 0 }
  0x92   : > { %1528 = dma.done.wait (%p2178_p7), %s270_s17, 8192  }
  0x93   : > { %1530 = vsyncadd (%p2178_p7), %s270_s17, 4294959104  ;;  %s280_s24 = sand.u32 1, %s1545_s18   ;;  %p2179_p12 = scmp.ne.s32.totalorder %s2174_s14, 0 }
  0x94   : > { %s906_s15 = sshll.u32 %s280_s24, 2 }
  0x95   : > { %s1933_s4 = scalar_lea.vmem [#allocation10], %s906_s15 }
  0x96   : > { %1532 = dma.done.wait (%p2179_p12), %s270_s17, 64  }
  0x97   : > { %1534 = vsyncadd (%p2179_p12), %s270_s17, 4294967232  ;;  %v1596_v0 = vmov 0.0|0.0   ;;  %v1597_v1 = vmov 0.0   ;;  %vm1598_vm0 = vmmov 0   ;;  %v340_v2 = vld [vmem:[%s1926_s29] sm:$0xff]  ;;  %v341_v3 = vld [vmem:[%s1926_s29 + $0x8] sm:$0xff] }
  0x98   : > { %1130 = vmatprep.subr.bf16.mxu0 %v1596_v0  ;;  %1154 = vmatprep.subr.bf16.mxu1 %v1596_v0  ;;  %328 = vst [vmem:[#allocation2] sm:$0x3] %v1597_v1  ;;  %329 = vst [vmem:[#allocation2 + $0x2] sm:$0x3] %v1597_v1  ;;  %v356_v4 = vld [vmem:[%s1926_s29 + $0x80] sm:$0xff]  ;;  %v1131_v5 = vpack.c.bf16 %v341_v3, %v340_v2  ;;  %v357_v6 = vld [vmem:[%s1926_s29 + $0x88] sm:$0xff] }
  0x99   : > { %330 = vst [vmem:[#allocation2 + $0x4] sm:$0x3] %v1597_v1  ;;  %331 = vst [vmem:[#allocation2 + $0x6] sm:$0x3] %v1597_v1  ;;  %1022 = vmatprep.mubr.msk.f32.mxu0 %vm1598_vm0, %v1597_v1  ;;  %1057 = vmatprep.mubr.msk.f32.mxu1 %vm1598_vm0, %v1597_v1  ;;  %v1155_v7 = vpack.c.bf16 %v357_v6, %v356_v4  ;;  %v342_v8 = vld [vmem:[%s1926_s29 + $0x10] sm:$0xff]  ;;  %v343_v9 = vld [vmem:[%s1926_s29 + $0x18] sm:$0xff] }
  0x9a   : > { %1132 = vmatpush3.bf16.xpose.msra.mxu0 %v1131_v5  ;;  %v358_v10 = vld [vmem:[%s1926_s29 + $0x90] sm:$0xff]  ;;  %v359_v11 = vld [vmem:[%s1926_s29 + $0x98] sm:$0xff]  ;;  %v1134_v12 = vpack.c.bf16 %v343_v9, %v342_v8  ;;  %v344_v14 = vld [vmem:[%s1926_s29 + $0x20] sm:$0xff]  ;;  %s2180_s28 = sld [smem:[#allocation18_spill]]  ;;  %s314_s7 = scalar_lea.vmem [#allocation11], %s904_s1 }
  0x9b   : > { %1156 = vmatpush3.bf16.xpose.msra.mxu1 %v1155_v7  ;;  %1133 = vmatprep.subr.bf16.mxu0 %v1596_v0  ;;  %v1158_v13 = vpack.c.bf16 %v359_v11, %v358_v10  ;;  %v345_v15 = vld [vmem:[%s1926_s29 + $0x28] sm:$0xff]  ;;  %v360_v16 = vld [vmem:[%s1926_s29 + $0xa0] sm:$0xff]  ;;  %v346_v20 = vld [vmem:[%s1926_s29 + $0x30] sm:$0xff]  ;;  %s750_s8 = sshll.u32 %s314_s7, 4  ;;  %s2181_s20 = sld [smem:[#allocation25_spill]]  ;;  %s2063_s8 = int_to_ptr.vmem [resolvable:$true] %s750_s8 }
  0x9c   : > { %1157 = vmatprep.subr.bf16.mxu1 %v1596_v0  ;;  %v361_v17 = vld [vmem:[%s1926_s29 + $0xa8] sm:$0xff]  ;;  %v1137_v18 = vpack.c.bf16 %v345_v15, %v344_v14  ;;  %v347_v21 = vld [vmem:[%s1926_s29 + $0x38] sm:$0xff]  ;;  %v362_v22 = vld [vmem:[%s1926_s29 + $0xb0] sm:$0xff]  ;;  %s736_s26 = scalar_lea.sflag [#allocation7], %s1912_s9  ;;  %s1447_s11 = scalar_lea.vmem %s2063_s8, 128 }
  0x9d   : > { %v1161_v19 = vpack.c.bf16 %v361_v17, %v360_v16  ;;  %v363_v23 = vld [vmem:[%s1926_s29 + $0xb8] sm:$0xff]  ;;  %v1140_v24 = vpack.c.bf16 %v347_v21, %v346_v20  ;;  %v348_v26 = vld [vmem:[%s1926_s29 + $0x40] sm:$0xff]  ;;  %v349_v27 = vld [vmem:[%s1926_s29 + $0x48] sm:$0xff]  ;;  %p1448_p10 = scmp.ne.s32.totalorder %s2063_s8, %s1447_s11  ;;  %p2183_p5 = scmp.ne.s32.totalorder %s2166_s25, 0 }
  0x9e   : > { %v1164_v25 = vpack.c.bf16 %v363_v23, %v362_v22  ;;  %v364_v28 = vld [vmem:[%s1926_s29 + $0xc0] sm:$0xff]  ;;  %v365_v29 = vld [vmem:[%s1926_s29 + $0xc8] sm:$0xff]  ;;  %v1143_v30 = vpack.c.bf16 %v349_v27, %v348_v26  ;;  %v350_v32 = vld [vmem:[%s1926_s29 + $0x50] sm:$0xff] }
  0x9f   : > { %v1167_v31 = vpack.c.bf16 %v365_v29, %v364_v28  ;;  %v351_v33 = vld [vmem:[%s1926_s29 + $0x58] sm:$0xff]  ;;  %v366_v34 = vld [vmem:[%s1926_s29 + $0xd0] sm:$0xff]  ;;  %v352_v38 = vld [vmem:[%s1926_s29 + $0x60] sm:$0xff]  ;;  %p1449_p1 = pnand %p1448_p10, %p2183_p5 }
  0xa0   : > { %v367_v35 = vld [vmem:[%s1926_s29 + $0xd8] sm:$0xff]  ;;  %v1146_v36 = vpack.c.bf16 %v351_v33, %v350_v32  ;;  %v353_v39 = vld [vmem:[%s1926_s29 + $0x68] sm:$0xff]  ;;  %v368_v40 = vld [vmem:[%s1926_s29 + $0xe0] sm:$0xff]  ;;  %s921_s14 = sshll.u32 %s2180_s28, 7 }
  0xa1   : > { %v1170_v37 = vpack.c.bf16 %v367_v35, %v366_v34  ;;  %v369_v41 = vld [vmem:[%s1926_s29 + $0xe8] sm:$0xff]  ;;  %v1149_v42 = vpack.c.bf16 %v353_v39, %v352_v38  ;;  %v354_v44 = vld [vmem:[%s1926_s29 + $0x70] sm:$0xff]  ;;  %v355_v45 = vld [vmem:[%s1926_s29 + $0x78] sm:$0xff]  ;;  %s2182_s1 = smov %s2181_s20  ;;  %s2061_s22 = scalar_lea.hbm %s2181_s20, %s921_s14 }
  0xa2   : > { %1135 = vmatpush3.bf16.xpose.msra.mxu0 %v1134_v12  ;;  %v1173_v43 = vpack.c.bf16 %v369_v41, %v368_v40  ;;  %v370_v46 = vld [vmem:[%s1926_s29 + $0xf0] sm:$0xff]  ;;  %v371_v47 = vld [vmem:[%s1926_s29 + $0xf8] sm:$0xff]  ;;  %v1152_v48 = vpack.c.bf16 %v355_v45, %v354_v44  ;;  %v372_v50 = vld [vmem:[%s1926_s29 + $0x100] sm:$0xff]  ;;  %p1450_p0 = pneg %p1449_p1 }
  0xa3   : > { %1159 = vmatpush3.bf16.xpose.msra.mxu1 %v1158_v13  ;;  %1136 = vmatprep.subr.bf16.mxu0 %v1596_v0  ;;  %v1176_v49 = vpack.c.bf16 %v371_v47, %v370_v46  ;;  %v373_v51 = vld [vmem:[%s1926_s29 + $0x108] sm:$0xff]  ;;  %v388_v52 = vld [vmem:[%s1926_s29 + $0x180] sm:$0xff]  ;;  %v336_v54 = vld [vmem:[%s1918_s6] sm:$0x3] }
  0xa4   : > { %1160 = vmatprep.subr.bf16.mxu1 %v1596_v0  ;;  %v389_v53 = vld [vmem:[%s1926_s29 + $0x188] sm:$0xff]  ;;  %v1179_v55 = vpack.c.bf16 %v373_v51, %v372_v50  ;;  %v337_v56 = vld [vmem:[%s1918_s6 + $0x2] sm:$0x3]  ;;  %v376_v2 = vld [vmem:[%s1926_s29 + $0x120] sm:$0xff] }
  0xa5   : > { %v1203_v57 = vpack.c.bf16 %v389_v53, %v388_v52  ;;  %v374_v58 = vld [vmem:[%s1926_s29 + $0x110] sm:$0xff]  ;;  %v375_v59 = vld [vmem:[%s1926_s29 + $0x118] sm:$0xff]  ;;  %v377_v3 = vld [vmem:[%s1926_s29 + $0x128] sm:$0xff] }
  0xa6   : > { %v390_v60 = vld [vmem:[%s1926_s29 + $0x190] sm:$0xff]  ;;  %v391_v61 = vld [vmem:[%s1926_s29 + $0x198] sm:$0xff]  ;;  %v1182_v62 = vpack.c.bf16 %v375_v59, %v374_v58  ;;  %v392_v4 = vld [vmem:[%s1926_s29 + $0x1a0] sm:$0xff]  ;;  %v1185_v6 = vpack.c.bf16 %v377_v3, %v376_v2 }
  0xa7   : > { %v1206_v63 = vpack.c.bf16 %v391_v61, %v390_v60  ;;  %v393_v5 = vld [vmem:[%s1926_s29 + $0x1a8] sm:$0xff]  ;;  %v378_v7 = vld [vmem:[%s1926_s29 + $0x130] sm:$0xff]  ;;  %v379_v8 = vld [vmem:[%s1926_s29 + $0x138] sm:$0xff] }
  0xa8   : > { %v394_v9 = vld [vmem:[%s1926_s29 + $0x1b0] sm:$0xff]  ;;  %v395_v10 = vld [vmem:[%s1926_s29 + $0x1b8] sm:$0xff]  ;;  %v1188_v11 = vpack.c.bf16 %v379_v8, %v378_v7  ;;  %v380_v13 = vld [vmem:[%s1926_s29 + $0x140] sm:$0xff] }
  0xa9   : > { %v1212_v12 = vpack.c.bf16 %v395_v10, %v394_v9  ;;  %v381_v14 = vld [vmem:[%s1926_s29 + $0x148] sm:$0xff]  ;;  %v396_v15 = vld [vmem:[%s1926_s29 + $0x1c0] sm:$0xff]  ;;  %v383_v20 = vld [vmem:[%s1926_s29 + $0x158] sm:$0xff] }
  0xaa   : > { %1138 = vmatpush3.bf16.xpose.msra.mxu0 %v1137_v18  ;;  %v397_v16 = vld [vmem:[%s1926_s29 + $0x1c8] sm:$0xff]  ;;  %v1191_v17 = vpack.c.bf16 %v381_v14, %v380_v13  ;;  %v398_v21 = vld [vmem:[%s1926_s29 + $0x1d0] sm:$0xff]  ;;  %v399_v22 = vld [vmem:[%s1926_s29 + $0x1d8] sm:$0xff] }
  0xab   : > { %1162 = vmatpush3.bf16.xpose.msra.mxu1 %v1161_v19  ;;  %1139 = vmatprep.subr.bf16.mxu0 %v1596_v0  ;;  %v1215_v18 = vpack.c.bf16 %v397_v16, %v396_v15  ;;  %v382_v19 = vld [vmem:[%s1926_s29 + $0x150] sm:$0xff]  ;;  %v385_v26 = vld [vmem:[%s1926_s29 + $0x168] sm:$0xff]  ;;  %v400_v27 = vld [vmem:[%s1926_s29 + $0x1e0] sm:$0xff] }
  0xac   : > { %1163 = vmatprep.subr.bf16.mxu1 %v1596_v0  ;;  %v1194_v23 = vpack.c.bf16 %v383_v20, %v382_v19  ;;  %v401_v28 = vld [vmem:[%s1926_s29 + $0x1e8] sm:$0xff]  ;;  %v387_v32 = vld [vmem:[%s1926_s29 + $0x178] sm:$0xff]  ;;  %v402_v33 = vld [vmem:[%s1926_s29 + $0x1f0] sm:$0xff] }
  0xad   : > { %v403_v34 = vld [vmem:[%s1926_s29 + $0x1f8] sm:$0xff]  ;;  %v332_v39 = vld [vmem:[#allocation2] sm:$0x3]  ;;  %v333_v40 = vld [vmem:[#allocation2 + $0x2] sm:$0x3] }
  0xae   : > { %v339_v38 = vld [vmem:[%s1918_s6 + $0x6] sm:$0x3]  ;;  %v908_v46 = vld [vmem:[%s1933_s4] ss:$0 sm:$0xff]  ;;  %v909_v47 = vld [vmem:[%s1933_s4 + $0x1] ss:$0 sm:$0xff] }
  0xaf   : > { %v334_v52 = vld [vmem:[#allocation2 + $0x4] sm:$0x3]  ;;  %v335_v53 = vld [vmem:[#allocation2 + $0x6] sm:$0x3]  ;;  %v910_v60 = vld [vmem:[%s1933_s4 + $0x2] ss:$0 sm:$0xff] }
  0xb0   : > { %v911_v61 = vld [vmem:[%s1933_s4 + $0x3] ss:$0 sm:$0xff] }
  0xb2   : > { %1141 = vmatpush3.bf16.xpose.msra.mxu0 %v1140_v24  ;;  %v1218_v24 = vpack.c.bf16 %v399_v22, %v398_v21 }
  0xb3   : > { %1165 = vmatpush3.bf16.xpose.msra.mxu1 %v1164_v25  ;;  %1142 = vmatprep.subr.bf16.mxu0 %v1596_v0  ;;  %v384_v25 = vld [vmem:[%s1926_s29 + $0x160] sm:$0xff] }
  0xb4   : > { %1166 = vmatprep.subr.bf16.mxu1 %v1596_v0  ;;  %v1197_v29 = vpack.c.bf16 %v385_v26, %v384_v25 }
  0xba   : > { %1144 = vmatpush3.bf16.xpose.msra.mxu0 %v1143_v30  ;;  %v1221_v30 = vpack.c.bf16 %v401_v28, %v400_v27 }
  0xbb   : > { %1168 = vmatpush3.bf16.xpose.msra.mxu1 %v1167_v31  ;;  %1145 = vmatprep.subr.bf16.mxu0 %v1596_v0  ;;  %v386_v31 = vld [vmem:[%s1926_s29 + $0x170] sm:$0xff] }
  0xbc   : > { %1169 = vmatprep.subr.bf16.mxu1 %v1596_v0  ;;  %v1200_v35 = vpack.c.bf16 %v387_v32, %v386_v31 }
  0xc2   : > { %1147 = vmatpush3.bf16.xpose.msra.mxu0 %v1146_v36  ;;  %v1224_v36 = vpack.c.bf16 %v403_v34, %v402_v33 }
  0xc3   : > { %1171 = vmatpush3.bf16.xpose.msra.mxu1 %v1170_v37  ;;  %1148 = vmatprep.subr.bf16.mxu0 %v1596_v0  ;;  %v338_v37 = vld [vmem:[%s1918_s6 + $0x4] sm:$0x3]  ;;  %s1599_s6 = smov [#allocation11]  }
  0xc4   : > { %1172 = vmatprep.subr.bf16.mxu1 %v1596_v0  ;;  %s1451_s5 = sshll.u32 %s1599_s6, 4  ;;  %s1452_s5 = int_to_ptr.vmem [resolvable:$false] %s1451_s5 }
  0xc5   : > { %s1453_s16 = scalar_lea.vmem %s1452_s5, 256  ;;  %p1454_p11 = scmp.lt.s32.totalorder %s2063_s8, %s1452_s5 }
  0xc6   : > { %p1455_p9 = scmp.lt.s32.totalorder %s1453_s16, %s1447_s11 }
  0xc8   : > { %p1456_p6 = por %p1455_p9, %p1454_p11 }
  0xca   : > { %1150 = vmatpush3.bf16.xpose.msra.mxu0 %v1149_v42  ;;  %p1457_p13 = pnand %p1456_p6, %p1450_p0 }
  0xcb   : > { %1174 = vmatpush3.bf16.xpose.msra.mxu1 %v1173_v43  ;;  %1151 = vmatprep.subr.bf16.mxu0 %v1596_v0 }
  0xcc   : > { %1175 = vmatprep.subr.bf16.mxu1 %v1596_v0 }
  0xd2   : > { %1153 = vmatpush3.bf16.xpose.msra.mxu0 %v1152_v48 }
  0xd3   : > { %1177 = vmatpush3.bf16.xpose.msra.mxu1 %v1176_v49  ;;  %1178 = vmatprep.subr.bf16.mxu0 %v1596_v0 }
  0xd4   : > { %1202 = vmatprep.subr.bf16.mxu1 %v1596_v0 }
  0xd9   : > { %1023 = vmatmul.mubr.f32.vlgmr.msra.gmra.mrb[0].mxu0 %v336_v54 }
  0xda   : > { %1058 = vmatmul.mubr.f32.vlgmr.msra.gmra.mrb[0].mxu1 %v337_v56  ;;  %1180 = vmatpush3.bf16.xpose.msra.mxu0 %v1179_v55 }
  0xdb   : > { %1204 = vmatpush3.bf16.xpose.msra.mxu1 %v1203_v57  ;;  %1181 = vmatprep.subr.bf16.mxu0 %v1596_v0 }
  0xdc   : > { %1205 = vmatprep.subr.bf16.mxu1 %v1596_v0  ;;  %1092 = vmatprep.mubr.msk.f32.mxu0 %vm1598_vm0, %v1597_v1 }
  0xdd   : > { %1127 = vmatprep.mubr.msk.f32.mxu1 %vm1598_vm0, %v1597_v1  ;;  %v1209_v1 = vpack.c.bf16 %v393_v5, %v392_v4 }
  0xe2   : > { %1183 = vmatpush3.bf16.xpose.msra.mxu0 %v1182_v62 }
  0xe3   : > { %1207 = vmatpush3.bf16.xpose.msra.mxu1 %v1206_v63  ;;  %1184 = vmatprep.subr.bf16.mxu0 %v1596_v0 }
  0xe4   : > { %1208 = vmatprep.subr.bf16.mxu1 %v1596_v0 }
  0xea   : > { %1186 = vmatpush3.bf16.xpose.msra.mxu0 %v1185_v6 }
  0xeb   : > { %1210 = vmatpush3.bf16.xpose.msra.mxu1 %v1209_v1  ;;  %1187 = vmatprep.subr.bf16.mxu0 %v1596_v0 }
  0xec   : > { %1211 = vmatprep.subr.bf16.mxu1 %v1596_v0 }
  0xf2   : > { %1189 = vmatpush3.bf16.xpose.msra.mxu0 %v1188_v11 }
  0xf3   : > { %1213 = vmatpush3.bf16.xpose.msra.mxu1 %v1212_v12  ;;  %1190 = vmatprep.subr.bf16.mxu0 %v1596_v0 }
  0xf4   : > { %1214 = vmatprep.subr.bf16.mxu1 %v1596_v0 }
  0xfa   : > { %1192 = vmatpush3.bf16.xpose.msra.mxu0 %v1191_v17 }
  0xfb   : > { %1216 = vmatpush3.bf16.xpose.msra.mxu1 %v1215_v18  ;;  %1193 = vmatprep.subr.bf16.mxu0 %v1596_v0 }
  0xfc   : > { %1217 = vmatprep.subr.bf16.mxu1 %v1596_v0 }
 0x102   : > { %1195 = vmatpush3.bf16.xpose.msra.mxu0 %v1194_v23 }
 0x103   : > { %1219 = vmatpush3.bf16.xpose.msra.mxu1 %v1218_v24  ;;  %1196 = vmatprep.subr.bf16.mxu0 %v1596_v0 }
 0x104   : > { %1220 = vmatprep.subr.bf16.mxu1 %v1596_v0 }
 0x10a   : > { %1198 = vmatpush3.bf16.xpose.msra.mxu0 %v1197_v29 }
 0x10b   : > { %1222 = vmatpush3.bf16.xpose.msra.mxu1 %v1221_v30  ;;  %1199 = vmatprep.subr.bf16.mxu0 %v1596_v0 }
 0x10c   : > { %1223 = vmatprep.subr.bf16.mxu1 %v1596_v0 }
 0x112   : > { %1201 = vmatpush3.bf16.xpose.msra.mxu0 %v1200_v35 }
 0x113   : > { %1225 = vmatpush3.bf16.xpose.msra.mxu1 %v1224_v36 }
 0x119   : > { %1093 = vmatmul.mubr.f32.vlgmr.msra.gmra.mrb[2].mxu0 %v338_v37 }
 0x11a   : > { %1128 = vmatmul.mubr.f32.vlgmr.msra.gmra.mrb[2].mxu1 %v339_v38 }
 0x1ac   : > { %v470_v41 = vpop.f32.mrb[0].mxu0 }
 0x1ad   : > { %v684_v42 = vadd.f32 %v470_v41, %v332_v39  ;;  %v540_v43 = vpop.f32.mrb[0].mxu1  ;;  %v1024_v44 = vpop.f32.mrb[1].mxu0 }
 0x1ae   : > { %v685_v0 = vadd.f32 %v540_v43, %v333_v40  ;;  %v1059_v45 = vpop.f32.mrb[1].mxu1 }
 0x1af   : > { %688 = vst [vmem:[#allocation2] sm:$0x3] %v684_v42 }
 0x1b0   : > { %689 = vst [vmem:[#allocation2 + $0x2] sm:$0x3] %v685_v0 }
 0x1b6   : > { %v695_v48 = vld [vmem:[#allocation2] sm:$0x3] }
 0x1b7   : > { %v696_v49 = vld [vmem:[#allocation2 + $0x2] sm:$0x3]  ;;  %v727_v50 = vadd.f32 %v908_v46, %v695_v48 }
 0x1b8   : > { %v728_v51 = vadd.f32 %v909_v47, %v696_v49 }
 0x1b9   : > { %731 = vst [vmem:[%s314_s7] sm:$0x3] %v727_v50 }
 0x1ba   : > { %732 = vst [vmem:[%s314_s7 + $0x2] sm:$0x3] %v728_v51 }
 0x1ec   : > { %v610_v54 = vpop.f32.mrb[2].mxu0 }
 0x1ed   : > { %v686_v55 = vadd.f32 %v610_v54, %v334_v52  ;;  %v680_v56 = vpop.f32.mrb[2].mxu1  ;;  %v1094_v57 = vpop.f32.mrb[3].mxu0 }
 0x1ee   : > { %v687_v58 = vadd.f32 %v680_v56, %v335_v53  ;;  %v1129_v59 = vpop.f32.mrb[3].mxu1 }
 0x1ef   : > { %690 = vst [vmem:[#allocation2 + $0x4] sm:$0x3] %v686_v55 }
 0x1f0   : > { %691 = vst [vmem:[#allocation2 + $0x6] sm:$0x3] %v687_v58 }
 0x1f6   : > { %v697_v62 = vld [vmem:[#allocation2 + $0x4] sm:$0x3] }
 0x1f7   : > { %v698_v63 = vld [vmem:[#allocation2 + $0x6] sm:$0x3]  ;;  %v729_v2 = vadd.f32 %v910_v60, %v697_v62 }
 0x1f8   : > { %v730_v3 = vadd.f32 %v911_v61, %v698_v63 }
 0x1f9   : > { %733 = vst [vmem:[%s314_s7 + $0x4] sm:$0x3] %v729_v2 }
 0x1fa   : > { %734 = vst [vmem:[%s314_s7 + $0x6] sm:$0x3] %v730_v3 }
 0x1fb   : > { %1460 = shalt.err (!%p1457_p13)
}
 0x1fc   : > { %s1461_s2 = scalar_lea.hbm %s2061_s22, 128  ;;  %s1465_s24 = scalar_lea.hbm %s2182_s1, 256 }
 0x1fd   : > { %p1462_p8 = scmp.ne.s32.totalorder %s2061_s22, %s1461_s2  ;;  %p1466_p2 = scmp.lt.u32.totalorder %s2061_s22, %s2182_s1 }
 0x1fe   : > { %p1467_p7 = scmp.lt.u32.totalorder %s1465_s24, %s1461_s2  ;;  %p1469_p10 = scmp.lt.u32.totalorder %s1461_s2, %s2061_s22 }
 0x1ff   : > { %p1463_p3 = pnand %p1462_p8, %p2183_p5 }
 0x200   : > { %p1468_p12 = por %p1467_p7, %p1466_p2 }
 0x201   : > { %p1464_p4 = pneg %p1463_p3 }
 0x202   : > { %p1470_p1 = por %p1469_p10, %p1468_p12 }
 0x204   : > { %p1471_p0 = pnand %p1470_p1, %p1464_p4 }
 0x206   : > { %1474 = shalt.err (!%p1471_p0)
}
 0x207   : > { %s1600_s28 = smov 32   ;;  %s1601_s7 = smov 2  }
 0x208   : > { %1232 = dma.vmem_to_hbm [thread:$0]  (%p2183_p5), %s2063_s8, 128, %s2061_s22, %s736_s26, %s1600_s28, %s1600_s28, %s1601_s7  }
 0x209 PF: > { %s765_s14 = sand.u32 1, %s1565_s23   ;;  %p2184_p11 = scmp.ne.s32.totalorder %s2167_s12, 0 }
 0x20a   : > { %p2185_p9 = scmp.ge.s32.totalorder %s1585_s27, 2  ;;  %s766_s30 = scalar_lea.sflag [#allocation7], %s765_s14 }
 0x20c   : > { %p1245_p6 = pnand %p2185_p9, %p2184_p11 }
 0x20e   : > { %1536 = dma.done.wait (!%p1245_p6), %s766_s30, 128  }
 0x20f   : > { %1538 = vsyncadd (!%p1245_p6), %s766_s30, 4294967168  ;;  %s24_s27 = sadd.s32 1, %s1585_s27   ;;  %s2186_s25 = sld [smem:[#allocation16_spill]] }
 0x210   : > { %p21_p13 = scmp.ge.s32.totalorder %s24_s27, 4   ;;  %s2187_s22 = sld [smem:[#allocation21_spill]] }
 0x211   : > { %s2188_s9 = sld [smem:[#allocation17_spill]]  ;;  %s2189_s24 = sld [smem:[#allocation22_spill]] }
 0x212   : > { %s2190_s8 = sld [smem:[#allocation19_spill]]  ;;  %s2191_s26 = sld [smem:[#allocation20_spill]] }
 0x213   : > { %s2192_s17 = smov %s1545_s18  ;;  %s2193_s18 = smov %s1549_s19 }
 0x214   : > { %s2194_s19 = smov %s1854_s13  ;;  %s2195_s20 = smov %s1557_s21 }
 0x215   : > { %s2196_s21 = smov %s2186_s25  ;;  %s2197_s23 = smov %s1569_s0 }
 0x216   :  { %23 = sbr.rel (!%p21_p13) target bundleno = 16 (0x10), region = 109 }
 0x217   : > { %s2198_s0 = smov %s2188_s9 }
 0x218   : > { %s2199_s25 = smov %s2190_s8 }
 0x21d   :  { %771 = vsyncpa [#allocation6], 1 }
 0x21e   :  { %773 = vsyncpa [#allocation6 + $0x1], 1 }
 0x21f   :  { %774 = vsyncpa [#allocation9], 1 }
 0x220   :  { %776 = vsyncpa [#allocation9 + $0x1], 1 }
 0x221   :  { %777 = vsyncpa [#allocation7], 1 }
 0x222   :  { %779 = vsyncpa [#allocation7 + $0x1], 1 }

</bundles_post_ra>
